<compile_context>
chip_gen: v7x
topology: tpu7x:2x2x1
jax: 0.10.0
libtpu: 0.0.40
codegen_flags: <defaults>
</compile_context>

<pallas_src>
import functools

import jax
import jax.numpy as jnp
from jax.experimental import pallas as pl
from jax.experimental.pallas import tpu as pltpu


def _round_up(x, m):
    return ((x + m - 1) // m) * m


def _choose_b_tile(B, block_batch=1024):
    """Batch tile: multiple of 8, <= block_batch, minimal padding; split into
    >=2 tiles once the batch is large enough so the "parallel" grid axis can
    shard across v7x's two TensorCores."""
    B8 = _round_up(B, 8)
    if B8 <= block_batch:
        if B8 >= 1024:
            return _round_up((B8 + 1) // 2, 8)   # two tiles for v7x megacore
        return B8
    best = None
    for c in (1024, 512, 256):
        if c > block_batch:
            continue
        pad = _round_up(B, c) - B
        key = (pad, -c)                          # least padding, then biggest tile
        if best is None or key < best[1]:
            best = (c, key)
    if best is not None:
        return best[0]
    return max(8, (block_batch // 8) * 8)


_GATHER_WINDOW = 128  # max in-flight gathered rows (4 DMAs per row)


# ----------------------------- Pallas kernel --------------------------------
def _ncf_kernel(num_mlp_layers, b_tile, *refs):
    # ref order (PrefetchScalarGridSpec):
    #   uid, iid (SMEM scalar prefetch),
    #   gmf_user_tbl, gmf_item_tbl, mlp_user_tbl, mlp_item_tbl   (HBM, pl.ANY),
    #   w1_u, w1_i, b1, (w_l, b_l) for layers 2..L, w_out_gmf, w_out_mlp, b_out,
    #   out_ref,
    #   gu_buf, gi_buf, mu_buf, mi_buf, sems                     (scratch)
    uid_ref, iid_ref, gu_hbm, gi_hbm, mu_hbm, mi_hbm = refs[:6]
    w1u_ref, w1i_ref, b1_ref = refs[6:9]
    n_tail = 2 * (num_mlp_layers - 1)
    layer_refs = refs[9:9 + n_tail]
    wg_ref, wm_ref, bo_ref = refs[9 + n_tail:12 + n_tail]
    out_ref = refs[12 + n_tail]
    gu_buf, gi_buf, mu_buf, mi_buf, sems = refs[13 + n_tail:]

    base = pl.program_id(0) * b_tile
    inflight = min(b_tile, _GATHER_WINDOW)

    # ---- fused embedding gather: per-row DMAs HBM -> VMEM scratch ----------
    def _issue(r):
        u = uid_ref[base + r]
        it = iid_ref[base + r]
        pltpu.make_async_copy(gu_hbm.at[u], gu_buf.at[r], sems.at[0]).start()
        pltpu.make_async_copy(gi_hbm.at[it], gi_buf.at[r], sems.at[1]).start()
        pltpu.make_async_copy(mu_hbm.at[u], mu_buf.at[r], sems.at[2]).start()
        pltpu.make_async_copy(mi_hbm.at[it], mi_buf.at[r], sems.at[3]).start()

    def _wait_one_row():
        # All row copies of a table have identical sizes, so a descriptor of
        # the same shape retires one outstanding copy per table.
        pltpu.make_async_copy(gu_hbm.at[0], gu_buf.at[0], sems.at[0]).wait()
        pltpu.make_async_copy(gi_hbm.at[0], gi_buf.at[0], sems.at[1]).wait()
        pltpu.make_async_copy(mu_hbm.at[0], mu_buf.at[0], sems.at[2]).wait()
        pltpu.make_async_copy(mi_hbm.at[0], mi_buf.at[0], sems.at[3]).wait()

    def _issue_body(r, carry):
        _issue(r)
        if b_tile > inflight:            # static: only emit window-wait if needed
            @pl.when(r >= inflight)
            def _():
                _wait_one_row()
        return carry

    jax.lax.fori_loop(0, b_tile, _issue_body, 0)

    def _drain_body(r, carry):
        _wait_one_row()
        return carry

    jax.lax.fori_loop(0, inflight, _drain_body, 0)

    ugmf = gu_buf[...]
    igmf = gi_buf[...]
    umlp = mu_buf[...]
    imlp = mi_buf[...]
    cdt = w1u_ref.dtype                 # compute/storage dtype (f32 or bf16)

    # ---- GMF branch: VPU elementwise product --------------------------------
    gmf = ugmf * igmf

    # ---- MLP tower; first layer over the (umlp, imlp) split (no concat) -----
    h = (jnp.dot(umlp, w1u_ref[...], preferred_element_type=jnp.float32)
         + jnp.dot(imlp, w1i_ref[...], preferred_element_type=jnp.float32)
         + b1_ref[...])
    h = jnp.maximum(h, 0.0).astype(cdt)
    for i in range(num_mlp_layers - 1):
        w = layer_refs[2 * i][...]
        b = layer_refs[2 * i + 1][...]
        h = jnp.dot(h, w, preferred_element_type=jnp.float32) + b
        h = jnp.maximum(h, 0.0).astype(cdt)

    # ---- output layer: split weight, transposed-rhs dots -> lane-dense row --
    logit = (
        jax.lax.dot_general(wg_ref[...], gmf, (((1,), (1,)), ((), ())),
                            preferred_element_type=jnp.float32)
        + jax.lax.dot_general(wm_ref[...], h, (((1,), (1,)), ((), ())),
                              preferred_element_type=jnp.float32)
        + bo_ref[...]
    )                                   # (1, b_tile) f32
    out_ref[...] = jax.nn.sigmoid(logit).astype(out_ref.dtype)


# ------------------------------ Parameters ----------------------------------
def init_ncf_params(key, hidden_dim, user_num, item_num, mlp_layer_num,
                    dtype=jnp.float32):
    """Deterministic synthetic parameter init (shapes match the PyTorch module)."""
    mlp_emb_dim = hidden_dim * 2 ** (mlp_layer_num - 1)
    keys = jax.random.split(key, 8 + 2 * mlp_layer_num)
    ki = iter(keys)

    params = {
        "mlp_user_emb": (jax.random.normal(next(ki), (user_num, mlp_emb_dim)) * 0.05).astype(dtype),
        "mlp_item_emb": (jax.random.normal(next(ki), (item_num, mlp_emb_dim)) * 0.05).astype(dtype),
        "gmf_user_emb": (jax.random.normal(next(ki), (user_num, hidden_dim)) * 0.05).astype(dtype),
        "gmf_item_emb": (jax.random.normal(next(ki), (item_num, hidden_dim)) * 0.05).astype(dtype),
        "mlp_layers": [],
    }

    in_size = hidden_dim * 2 ** mlp_layer_num
    for _ in range(mlp_layer_num):
        out_size = in_size // 2
        w = (jax.random.normal(next(ki), (in_size, out_size)) / jnp.sqrt(in_size)).astype(dtype)
        b = (jax.random.normal(next(ki), (1, out_size)) * 0.01).astype(dtype)
        params["mlp_layers"].append((w, b))
        in_size = out_size

    params["w_out"] = (jax.random.normal(next(ki), (2 * hidden_dim, 1))
                       / jnp.sqrt(2 * hidden_dim)).astype(dtype)
    params["b_out"] = (jax.random.normal(next(ki), (1, 1)) * 0.01).astype(dtype)
    return params


# ------------------------------- Forward ------------------------------------
def ncf_forward(params, x, mlp_layer_num, block_batch=1024):
    """x: int32 [B, 2] with columns (user_id, item_id). Returns float32 [B]."""
    hidden_dim = params["gmf_user_emb"].shape[1]
    mlp_emb_dim = params["mlp_user_emb"].shape[1]
    emb_dtype = params["gmf_user_emb"].dtype

    B = x.shape[0]
    b_tile = _choose_b_tile(B, block_batch)
    Bp = _round_up(B, b_tile)
    nt = Bp // b_tile

    user = x[:, 0].astype(jnp.int32)
    item = x[:, 1].astype(jnp.int32)
    if Bp != B:
        # Pad ids with 0 (row 0 always exists); padded rows are dropped below.
        user = jnp.concatenate([user, jnp.zeros((Bp - B,), jnp.int32)])
        item = jnp.concatenate([item, jnp.zeros((Bp - B,), jnp.int32)])

    # Split the first MLP weight over the (umlp, imlp) halves of the former
    # concat, and split the output weight into per-branch row vectors.
    w1, b1 = params["mlp_layers"][0]
    w1_u = w1[:mlp_emb_dim, :]
    w1_i = w1[mlp_emb_dim:, :]
    w_out_gmf = params["w_out"][:hidden_dim, :].T   # [1, hidden_dim]
    w_out_mlp = params["w_out"][hidden_dim:, :].T   # [1, hidden_dim]

    tables = [params["gmf_user_emb"], params["gmf_item_emb"],
              params["mlp_user_emb"], params["mlp_item_emb"]]
    weights = [w1_u, w1_i, b1]
    for w, b in params["mlp_layers"][1:]:
        weights.extend([w, b])
    weights.extend([w_out_gmf, w_out_mlp, params["b_out"]])

    # Embedding tables stay in HBM (gathered in-kernel); weights are small and
    # stay VMEM-resident (constant block index across the grid).
    table_specs = [pl.BlockSpec(memory_space=pl.ANY)] * 4
    weight_specs = [pl.BlockSpec(w.shape, lambda i, *_: (0, 0)) for w in weights]
    # Lane-dense output: one (1, b_tile) row per grid step.
    out_spec = pl.BlockSpec((None, 1, b_tile), lambda i, *_: (i, 0, 0))

    # Advisory cost estimate.
    flops_per_row = 4 * hidden_dim
    in_size = 2 * mlp_emb_dim
    for _ in range(mlp_layer_num):
        out_size = in_size // 2
        flops_per_row += 2 * in_size * out_size
        in_size = out_size
    itemsize = jnp.dtype(emb_dtype).itemsize
    row_bytes = (2 * hidden_dim + 2 * mlp_emb_dim) * itemsize
    weight_bytes = sum(int(w.size) * jnp.dtype(w.dtype).itemsize for w in weights)
    cost = pl.CostEstimate(
        flops=int(flops_per_row) * Bp,
        transcendentals=Bp,
        bytes_accessed=int(Bp * row_bytes + weight_bytes + Bp * 8 + Bp * 4),
    )

    grid_spec = pltpu.PrefetchScalarGridSpec(
        num_scalar_prefetch=2,
        grid=(nt,),
        in_specs=table_specs + weight_specs,
        out_specs=out_spec,
        scratch_shapes=[
            pltpu.VMEM((b_tile, hidden_dim), emb_dtype),
            pltpu.VMEM((b_tile, hidden_dim), emb_dtype),
            pltpu.VMEM((b_tile, mlp_emb_dim), emb_dtype),
            pltpu.VMEM((b_tile, mlp_emb_dim), emb_dtype),
            pltpu.SemaphoreType.DMA((4,)),
        ],
    )

    out = pl.pallas_call(
        functools.partial(_ncf_kernel, mlp_layer_num, b_tile),
        out_shape=jax.ShapeDtypeStruct((nt, 1, b_tile), jnp.float32),
        grid_spec=grid_spec,
        compiler_params=pltpu.CompilerParams(
            dimension_semantics=("parallel",),
        ),
        cost_estimate=cost,
    )(user, item, *tables, *weights)

    return out.reshape(Bp)[:B]


# ------------------------------ Reference -----------------------------------
def ref_forward(params, x):
    """Pure-JAX f32 reference mirroring the PyTorch forward (with concats)."""
    f32 = lambda a: a.astype(jnp.float32)
    user, item = x[:, 0], x[:, 1]
    ugmf = f32(jnp.take(params["gmf_user_emb"], user, axis=0))
    igmf = f32(jnp.take(params["gmf_item_emb"], item, axis=0))
    umlp = f32(jnp.take(params["mlp_user_emb"], user, axis=0))
    imlp = f32(jnp.take(params["mlp_item_emb"], item, axis=0))
    gmf = ugmf * igmf
    h = jnp.concatenate([umlp, imlp], axis=-1)
    for w, b in params["mlp_layers"]:
        h = jnp.maximum(h @ f32(w) + f32(b), 0.0)
    feat = jnp.concatenate([gmf, h], axis=-1)
    return jax.nn.sigmoid(feat @ f32(params["w_out"]) + f32(params["b_out"]))[:, 0]


# -------------------------------- Main ---------------------------------------
if __name__ == "__main__":
    hidden_dim = 32
    user_num = 64
    item_num = 64
    mlp_layer_num = 3
    batch = 8

    key = jax.random.PRNGKey(0)
    pkey, ukey, ikey = jax.random.split(key, 3)

    users = jax.random.randint(ukey, (batch,), 0, user_num, dtype=jnp.int32)
    items = jax.random.randint(ikey, (batch,), 0, item_num, dtype=jnp.int32)
    x = jnp.stack([users, items], axis=1)  # [B, 2] int32

    # f32 parameters: tight correctness check.
    params = init_ncf_params(pkey, hidden_dim, user_num, item_num, mlp_layer_num)
    out = jax.block_until_ready(ncf_forward(params, x, mlp_layer_num))
    ref = ref_forward(params, x)
    assert out.shape == (batch,)
    assert jnp.allclose(out, ref, atol=2e-5, rtol=1e-4), (out, ref)

    # bf16 parameters (halves HBM traffic on v6e/v7x): loose check, since the
    # kernel keeps activations in bf16 between layers while accumulating in f32.
    params_bf16 = jax.tree_util.tree_map(lambda a: a.astype(jnp.bfloat16), params)
    out_bf16 = jax.block_until_ready(ncf_forward(params_bf16, x, mlp_layer_num))
    ref_bf16 = ref_forward(params_bf16, x)
    assert out_bf16.shape == (batch,)
    assert jnp.allclose(out_bf16, ref_bf16, atol=5e-2, rtol=5e-2), (out_bf16, ref_bf16)

    print("KERNEL_OK")
</pallas_src>

<mosaic_0001>
module attributes {stable_mosaic.version = 11 : i64} {
  func.func @_ncf_kernel(%arg0: i32, %arg1: memref<8xi32, #tpu.memory_space<smem>>, %arg2: memref<8xi32, #tpu.memory_space<smem>>, %arg3: memref<64x32xf32, #tpu.memory_space<any>>, %arg4: memref<64x32xf32, #tpu.memory_space<any>>, %arg5: memref<64x128xf32, #tpu.memory_space<any>>, %arg6: memref<64x128xf32, #tpu.memory_space<any>>, %arg7: memref<128x128xf32, #tpu.memory_space<vmem>>, %arg8: memref<128x128xf32, #tpu.memory_space<vmem>>, %arg9: memref<1x128xf32, #tpu.memory_space<vmem>>, %arg10: memref<128x64xf32, #tpu.memory_space<vmem>>, %arg11: memref<1x64xf32, #tpu.memory_space<vmem>>, %arg12: memref<64x32xf32, #tpu.memory_space<vmem>>, %arg13: memref<1x32xf32, #tpu.memory_space<vmem>>, %arg14: memref<1x32xf32, #tpu.memory_space<vmem>>, %arg15: memref<1x32xf32, #tpu.memory_space<vmem>>, %arg16: memref<1x1xf32, #tpu.memory_space<vmem>>, %arg17: memref<1x1x8xf32, #tpu.memory_space<vmem>>, %arg18: memref<8x32xf32, #tpu.memory_space<vmem>>, %arg19: memref<8x32xf32, #tpu.memory_space<vmem>>, %arg20: memref<8x128xf32, #tpu.memory_space<vmem>>, %arg21: memref<8x128xf32, #tpu.memory_space<vmem>>, %arg22: memref<4x!tpu.dma_semaphore, #tpu.memory_space<semaphore_mem>>) attributes {dimension_semantics = [#tpu.dimension_semantics<parallel>], iteration_bounds = array<i64: 1>, scalar_prefetch = 2 : i64, scratch_operands = 5 : i64, tpu.core_type = #tpu.core_type<tc>, window_params = [{}, {}, {}, {}, {pipeline_mode = #tpu.pipeline_mode<synchronous>, transform_indices = @transform_4, window_bounds = array<i64: 128, 128>}, {pipeline_mode = #tpu.pipeline_mode<synchronous>, transform_indices = @transform_5, window_bounds = array<i64: 128, 128>}, {pipeline_mode = #tpu.pipeline_mode<synchronous>, transform_indices = @transform_6, window_bounds = array<i64: 1, 128>}, {pipeline_mode = #tpu.pipeline_mode<synchronous>, transform_indices = @transform_7, window_bounds = array<i64: 128, 64>}, {pipeline_mode = #tpu.pipeline_mode<synchronous>, transform_indices = @transform_8, window_bounds = array<i64: 1, 64>}, {pipeline_mode = #tpu.pipeline_mode<synchronous>, transform_indices = @transform_9, window_bounds = array<i64: 64, 32>}, {pipeline_mode = #tpu.pipeline_mode<synchronous>, transform_indices = @transform_10, window_bounds = array<i64: 1, 32>}, {pipeline_mode = #tpu.pipeline_mode<synchronous>, transform_indices = @transform_11, window_bounds = array<i64: 1, 32>}, {pipeline_mode = #tpu.pipeline_mode<synchronous>, transform_indices = @transform_12, window_bounds = array<i64: 1, 32>}, {pipeline_mode = #tpu.pipeline_mode<synchronous>, transform_indices = @transform_13, window_bounds = array<i64: 1, 1>}, {transform_indices = @transform_14, window_bounds = array<i64: 1, 1, 8>}]} {
    %c8_i32 = arith.constant 8 : i32
    %0 = arith.muli %arg0, %c8_i32 : i32
    %c0_i32 = arith.constant 0 : i32
    %c8_i32_0 = arith.constant 8 : i32
    %1 = arith.addi %c0_i32, %c8_i32_0 : i32
    %c1_i32 = arith.constant 1 : i32
    scf.for %arg23 = %c0_i32 to %1 step %c1_i32  : i32 {
      %48 = arith.addi %0, %arg23 : i32
      %49 = arith.index_cast %48 : i32 to index
      %50 = memref.load %arg1[%49] : memref<8xi32, #tpu.memory_space<smem>>
      %51 = arith.addi %0, %arg23 : i32
      %52 = arith.index_cast %51 : i32 to index
      %53 = memref.load %arg2[%52] : memref<8xi32, #tpu.memory_space<smem>>
      %c0_i32_44 = arith.constant 0 : i32
      %c0_i32_45 = arith.constant 0 : i32
      %54 = tpu.memref_slice %arg3[%50, %c0_i32_45] : memref<64x32xf32, #tpu.memory_space<any>> -> memref<1x32xf32, #tpu.memory_space<any>>
      %55 = tpu.memref_squeeze %54 : memref<1x32xf32, #tpu.memory_space<any>> -> memref<32xf32, #tpu.memory_space<any>>
      %c0_i32_46 = arith.constant 0 : i32
      %56 = tpu.memref_slice %arg18[%arg23, %c0_i32_46] : memref<8x32xf32, #tpu.memory_space<vmem>> -> memref<1x32xf32, #tpu.memory_space<vmem>>
      %57 = tpu.memref_squeeze %56 : memref<1x32xf32, #tpu.memory_space<vmem>> -> memref<32xf32, #tpu.memory_space<vmem>>
      %58 = tpu.memref_slice %arg22[%c0_i32_44] : memref<4x!tpu.dma_semaphore, #tpu.memory_space<semaphore_mem>> -> memref<1x!tpu.dma_semaphore, #tpu.memory_space<semaphore_mem>>
      %59 = tpu.memref_squeeze %58 : memref<1x!tpu.dma_semaphore, #tpu.memory_space<semaphore_mem>> -> memref<!tpu.dma_semaphore, #tpu.memory_space<semaphore_mem>>
      tpu.enqueue_dma source(%55 : memref<32xf32, #tpu.memory_space<any>>) target(%57 : memref<32xf32, #tpu.memory_space<vmem>>) target_semaphore(%59 : memref<!tpu.dma_semaphore, #tpu.memory_space<semaphore_mem>>)
      %c1_i32_47 = arith.constant 1 : i32
      %c0_i32_48 = arith.constant 0 : i32
      %60 = tpu.memref_slice %arg4[%53, %c0_i32_48] : memref<64x32xf32, #tpu.memory_space<any>> -> memref<1x32xf32, #tpu.memory_space<any>>
      %61 = tpu.memref_squeeze %60 : memref<1x32xf32, #tpu.memory_space<any>> -> memref<32xf32, #tpu.memory_space<any>>
      %c0_i32_49 = arith.constant 0 : i32
      %62 = tpu.memref_slice %arg19[%arg23, %c0_i32_49] : memref<8x32xf32, #tpu.memory_space<vmem>> -> memref<1x32xf32, #tpu.memory_space<vmem>>
      %63 = tpu.memref_squeeze %62 : memref<1x32xf32, #tpu.memory_space<vmem>> -> memref<32xf32, #tpu.memory_space<vmem>>
      %64 = tpu.memref_slice %arg22[%c1_i32_47] : memref<4x!tpu.dma_semaphore, #tpu.memory_space<semaphore_mem>> -> memref<1x!tpu.dma_semaphore, #tpu.memory_space<semaphore_mem>>
      %65 = tpu.memref_squeeze %64 : memref<1x!tpu.dma_semaphore, #tpu.memory_space<semaphore_mem>> -> memref<!tpu.dma_semaphore, #tpu.memory_space<semaphore_mem>>
      tpu.enqueue_dma source(%61 : memref<32xf32, #tpu.memory_space<any>>) target(%63 : memref<32xf32, #tpu.memory_space<vmem>>) target_semaphore(%65 : memref<!tpu.dma_semaphore, #tpu.memory_space<semaphore_mem>>)
      %c2_i32 = arith.constant 2 : i32
      %c0_i32_50 = arith.constant 0 : i32
      %66 = tpu.memref_slice %arg5[%50, %c0_i32_50] : memref<64x128xf32, #tpu.memory_space<any>> -> memref<1x128xf32, #tpu.memory_space<any>>
      %67 = tpu.memref_squeeze %66 : memref<1x128xf32, #tpu.memory_space<any>> -> memref<128xf32, #tpu.memory_space<any>>
      %c0_i32_51 = arith.constant 0 : i32
      %68 = tpu.memref_slice %arg20[%arg23, %c0_i32_51] : memref<8x128xf32, #tpu.memory_space<vmem>> -> memref<1x128xf32, #tpu.memory_space<vmem>>
      %69 = tpu.memref_squeeze %68 : memref<1x128xf32, #tpu.memory_space<vmem>> -> memref<128xf32, #tpu.memory_space<vmem>>
      %70 = tpu.memref_slice %arg22[%c2_i32] : memref<4x!tpu.dma_semaphore, #tpu.memory_space<semaphore_mem>> -> memref<1x!tpu.dma_semaphore, #tpu.memory_space<semaphore_mem>>
      %71 = tpu.memref_squeeze %70 : memref<1x!tpu.dma_semaphore, #tpu.memory_space<semaphore_mem>> -> memref<!tpu.dma_semaphore, #tpu.memory_space<semaphore_mem>>
      tpu.enqueue_dma source(%67 : memref<128xf32, #tpu.memory_space<any>>) target(%69 : memref<128xf32, #tpu.memory_space<vmem>>) target_semaphore(%71 : memref<!tpu.dma_semaphore, #tpu.memory_space<semaphore_mem>>)
      %c3_i32 = arith.constant 3 : i32
      %c0_i32_52 = arith.constant 0 : i32
      %72 = tpu.memref_slice %arg6[%53, %c0_i32_52] : memref<64x128xf32, #tpu.memory_space<any>> -> memref<1x128xf32, #tpu.memory_space<any>>
      %73 = tpu.memref_squeeze %72 : memref<1x128xf32, #tpu.memory_space<any>> -> memref<128xf32, #tpu.memory_space<any>>
      %c0_i32_53 = arith.constant 0 : i32
      %74 = tpu.memref_slice %arg21[%arg23, %c0_i32_53] : memref<8x128xf32, #tpu.memory_space<vmem>> -> memref<1x128xf32, #tpu.memory_space<vmem>>
      %75 = tpu.memref_squeeze %74 : memref<1x128xf32, #tpu.memory_space<vmem>> -> memref<128xf32, #tpu.memory_space<vmem>>
      %76 = tpu.memref_slice %arg22[%c3_i32] : memref<4x!tpu.dma_semaphore, #tpu.memory_space<semaphore_mem>> -> memref<1x!tpu.dma_semaphore, #tpu.memory_space<semaphore_mem>>
      %77 = tpu.memref_squeeze %76 : memref<1x!tpu.dma_semaphore, #tpu.memory_space<semaphore_mem>> -> memref<!tpu.dma_semaphore, #tpu.memory_space<semaphore_mem>>
      tpu.enqueue_dma source(%73 : memref<128xf32, #tpu.memory_space<any>>) target(%75 : memref<128xf32, #tpu.memory_space<vmem>>) target_semaphore(%77 : memref<!tpu.dma_semaphore, #tpu.memory_space<semaphore_mem>>)
    }
    %c8_i32_1 = arith.constant 8 : i32
    %c0_i32_2 = arith.constant 0 : i32
    %c8_i32_3 = arith.constant 8 : i32
    %2 = arith.addi %c0_i32_2, %c8_i32_3 : i32
    %c1_i32_4 = arith.constant 1 : i32
    scf.for %arg23 = %c0_i32_2 to %2 step %c1_i32_4  : i32 {
      %c0_i32_44 = arith.constant 0 : i32
      %c0_i32_45 = arith.constant 0 : i32
      %c0_i32_46 = arith.constant 0 : i32
      %c0_i32_47 = arith.constant 0 : i32
      %48 = tpu.memref_slice %arg3[%c0_i32_44, %c0_i32_47] : memref<64x32xf32, #tpu.memory_space<any>> -> memref<1x32xf32, #tpu.memory_space<any>>
      %49 = tpu.memref_squeeze %48 : memref<1x32xf32, #tpu.memory_space<any>> -> memref<32xf32, #tpu.memory_space<any>>
      %c0_i32_48 = arith.constant 0 : i32
      %50 = tpu.memref_slice %arg18[%c0_i32_45, %c0_i32_48] : memref<8x32xf32, #tpu.memory_space<vmem>> -> memref<1x32xf32, #tpu.memory_space<vmem>>
      %51 = tpu.memref_squeeze %50 : memref<1x32xf32, #tpu.memory_space<vmem>> -> memref<32xf32, #tpu.memory_space<vmem>>
      %52 = tpu.memref_slice %arg22[%c0_i32_46] : memref<4x!tpu.dma_semaphore, #tpu.memory_space<semaphore_mem>> -> memref<1x!tpu.dma_semaphore, #tpu.memory_space<semaphore_mem>>
      %53 = tpu.memref_squeeze %52 : memref<1x!tpu.dma_semaphore, #tpu.memory_space<semaphore_mem>> -> memref<!tpu.dma_semaphore, #tpu.memory_space<semaphore_mem>>
      tpu.wait_dma2 semaphore(%53 : memref<!tpu.dma_semaphore, #tpu.memory_space<semaphore_mem>>) src(%49 : memref<32xf32, #tpu.memory_space<any>>) dst(%51 : memref<32xf32, #tpu.memory_space<vmem>>)
      %c0_i32_49 = arith.constant 0 : i32
      %c0_i32_50 = arith.constant 0 : i32
      %c1_i32_51 = arith.constant 1 : i32
      %c0_i32_52 = arith.constant 0 : i32
      %54 = tpu.memref_slice %arg4[%c0_i32_49, %c0_i32_52] : memref<64x32xf32, #tpu.memory_space<any>> -> memref<1x32xf32, #tpu.memory_space<any>>
      %55 = tpu.memref_squeeze %54 : memref<1x32xf32, #tpu.memory_space<any>> -> memref<32xf32, #tpu.memory_space<any>>
      %c0_i32_53 = arith.constant 0 : i32
      %56 = tpu.memref_slice %arg19[%c0_i32_50, %c0_i32_53] : memref<8x32xf32, #tpu.memory_space<vmem>> -> memref<1x32xf32, #tpu.memory_space<vmem>>
      %57 = tpu.memref_squeeze %56 : memref<1x32xf32, #tpu.memory_space<vmem>> -> memref<32xf32, #tpu.memory_space<vmem>>
      %58 = tpu.memref_slice %arg22[%c1_i32_51] : memref<4x!tpu.dma_semaphore, #tpu.memory_space<semaphore_mem>> -> memref<1x!tpu.dma_semaphore, #tpu.memory_space<semaphore_mem>>
      %59 = tpu.memref_squeeze %58 : memref<1x!tpu.dma_semaphore, #tpu.memory_space<semaphore_mem>> -> memref<!tpu.dma_semaphore, #tpu.memory_space<semaphore_mem>>
      tpu.wait_dma2 semaphore(%59 : memref<!tpu.dma_semaphore, #tpu.memory_space<semaphore_mem>>) src(%55 : memref<32xf32, #tpu.memory_space<any>>) dst(%57 : memref<32xf32, #tpu.memory_space<vmem>>)
      %c0_i32_54 = arith.constant 0 : i32
      %c0_i32_55 = arith.constant 0 : i32
      %c2_i32 = arith.constant 2 : i32
      %c0_i32_56 = arith.constant 0 : i32
      %60 = tpu.memref_slice %arg5[%c0_i32_54, %c0_i32_56] : memref<64x128xf32, #tpu.memory_space<any>> -> memref<1x128xf32, #tpu.memory_space<any>>
      %61 = tpu.memref_squeeze %60 : memref<1x128xf32, #tpu.memory_space<any>> -> memref<128xf32, #tpu.memory_space<any>>
      %c0_i32_57 = arith.constant 0 : i32
      %62 = tpu.memref_slice %arg20[%c0_i32_55, %c0_i32_57] : memref<8x128xf32, #tpu.memory_space<vmem>> -> memref<1x128xf32, #tpu.memory_space<vmem>>
      %63 = tpu.memref_squeeze %62 : memref<1x128xf32, #tpu.memory_space<vmem>> -> memref<128xf32, #tpu.memory_space<vmem>>
      %64 = tpu.memref_slice %arg22[%c2_i32] : memref<4x!tpu.dma_semaphore, #tpu.memory_space<semaphore_mem>> -> memref<1x!tpu.dma_semaphore, #tpu.memory_space<semaphore_mem>>
      %65 = tpu.memref_squeeze %64 : memref<1x!tpu.dma_semaphore, #tpu.memory_space<semaphore_mem>> -> memref<!tpu.dma_semaphore, #tpu.memory_space<semaphore_mem>>
      tpu.wait_dma2 semaphore(%65 : memref<!tpu.dma_semaphore, #tpu.memory_space<semaphore_mem>>) src(%61 : memref<128xf32, #tpu.memory_space<any>>) dst(%63 : memref<128xf32, #tpu.memory_space<vmem>>)
      %c0_i32_58 = arith.constant 0 : i32
      %c0_i32_59 = arith.constant 0 : i32
      %c3_i32 = arith.constant 3 : i32
      %c0_i32_60 = arith.constant 0 : i32
      %66 = tpu.memref_slice %arg6[%c0_i32_58, %c0_i32_60] : memref<64x128xf32, #tpu.memory_space<any>> -> memref<1x128xf32, #tpu.memory_space<any>>
      %67 = tpu.memref_squeeze %66 : memref<1x128xf32, #tpu.memory_space<any>> -> memref<128xf32, #tpu.memory_space<any>>
      %c0_i32_61 = arith.constant 0 : i32
      %68 = tpu.memref_slice %arg21[%c0_i32_59, %c0_i32_61] : memref<8x128xf32, #tpu.memory_space<vmem>> -> memref<1x128xf32, #tpu.memory_space<vmem>>
      %69 = tpu.memref_squeeze %68 : memref<1x128xf32, #tpu.memory_space<vmem>> -> memref<128xf32, #tpu.memory_space<vmem>>
      %70 = tpu.memref_slice %arg22[%c3_i32] : memref<4x!tpu.dma_semaphore, #tpu.memory_space<semaphore_mem>> -> memref<1x!tpu.dma_semaphore, #tpu.memory_space<semaphore_mem>>
      %71 = tpu.memref_squeeze %70 : memref<1x!tpu.dma_semaphore, #tpu.memory_space<semaphore_mem>> -> memref<!tpu.dma_semaphore, #tpu.memory_space<semaphore_mem>>
      tpu.wait_dma2 semaphore(%71 : memref<!tpu.dma_semaphore, #tpu.memory_space<semaphore_mem>>) src(%67 : memref<128xf32, #tpu.memory_space<any>>) dst(%69 : memref<128xf32, #tpu.memory_space<vmem>>)
    }
    %c0 = arith.constant 0 : index
    %c0_5 = arith.constant 0 : index
    %3 = vector.load %arg18[%c0, %c0_5] : memref<8x32xf32, #tpu.memory_space<vmem>>, vector<8x32xf32>
    %c0_6 = arith.constant 0 : index
    %c0_7 = arith.constant 0 : index
    %4 = vector.load %arg19[%c0_6, %c0_7] : memref<8x32xf32, #tpu.memory_space<vmem>>, vector<8x32xf32>
    %c0_8 = arith.constant 0 : index
    %c0_9 = arith.constant 0 : index
    %5 = vector.load %arg20[%c0_8, %c0_9] : memref<8x128xf32, #tpu.memory_space<vmem>>, vector<8x128xf32>
    %c0_10 = arith.constant 0 : index
    %c0_11 = arith.constant 0 : index
    %6 = vector.load %arg21[%c0_10, %c0_11] : memref<8x128xf32, #tpu.memory_space<vmem>>, vector<8x128xf32>
    %7 = arith.mulf %3, %4 : vector<8x32xf32>
    %c0_12 = arith.constant 0 : index
    %c0_13 = arith.constant 0 : index
    %8 = vector.load %arg7[%c0_12, %c0_13] : memref<128x128xf32, #tpu.memory_space<vmem>>, vector<128x128xf32>
    %cst = arith.constant dense<0.000000e+00> : vector<8x128xf32>
    %9 = tpu.matmul %5, %8, %cst {dimension_numbers = #tpu.dot_dimension_numbers<[1], [0], [0], [1], [0, 0, 1, 1], [], []>} : vector<8x128xf32>, vector<128x128xf32>, vector<8x128xf32> -> vector<8x128xf32>
    %c0_14 = arith.constant 0 : index
    %c0_15 = arith.constant 0 : index
    %10 = vector.load %arg8[%c0_14, %c0_15] : memref<128x128xf32, #tpu.memory_space<vmem>>, vector<128x128xf32>
    %cst_16 = arith.constant dense<0.000000e+00> : vector<8x128xf32>
    %11 = tpu.matmul %6, %10, %cst_16 {dimension_numbers = #tpu.dot_dimension_numbers<[1], [0], [0], [1], [0, 0, 1, 1], [], []>} : vector<8x128xf32>, vector<128x128xf32>, vector<8x128xf32> -> vector<8x128xf32>
    %12 = arith.addf %9, %11 : vector<8x128xf32>
    %c0_17 = arith.constant 0 : index
    %c0_18 = arith.constant 0 : index
    %13 = vector.load %arg9[%c0_17, %c0_18] : memref<1x128xf32, #tpu.memory_space<vmem>>, vector<1x128xf32>
    %14 = vector.broadcast %13 : vector<1x128xf32> to vector<8x128xf32>
    %15 = arith.addf %12, %14 : vector<8x128xf32>
    %cst_19 = arith.constant 0.000000e+00 : f32
    %16 = vector.broadcast %cst_19 : f32 to vector<8x128xf32>
    %17 = arith.maximumf %15, %16 : vector<8x128xf32>
    %c0_20 = arith.constant 0 : index
    %c0_21 = arith.constant 0 : index
    %18 = vector.load %arg10[%c0_20, %c0_21] : memref<128x64xf32, #tpu.memory_space<vmem>>, vector<128x64xf32>
    %c0_22 = arith.constant 0 : index
    %c0_23 = arith.constant 0 : index
    %19 = vector.load %arg11[%c0_22, %c0_23] : memref<1x64xf32, #tpu.memory_space<vmem>>, vector<1x64xf32>
    %cst_24 = arith.constant dense<0.000000e+00> : vector<8x64xf32>
    %20 = tpu.matmul %17, %18, %cst_24 {dimension_numbers = #tpu.dot_dimension_numbers<[1], [0], [0], [1], [0, 0, 1, 1], [], []>} : vector<8x128xf32>, vector<128x64xf32>, vector<8x64xf32> -> vector<8x64xf32>
    %21 = vector.broadcast %19 : vector<1x64xf32> to vector<8x64xf32>
    %22 = arith.addf %20, %21 : vector<8x64xf32>
    %cst_25 = arith.constant 0.000000e+00 : f32
    %23 = vector.broadcast %cst_25 : f32 to vector<8x64xf32>
    %24 = arith.maximumf %22, %23 : vector<8x64xf32>
    %c0_26 = arith.constant 0 : index
    %c0_27 = arith.constant 0 : index
    %25 = vector.load %arg12[%c0_26, %c0_27] : memref<64x32xf32, #tpu.memory_space<vmem>>, vector<64x32xf32>
    %c0_28 = arith.constant 0 : index
    %c0_29 = arith.constant 0 : index
    %26 = vector.load %arg13[%c0_28, %c0_29] : memref<1x32xf32, #tpu.memory_space<vmem>>, vector<1x32xf32>
    %cst_30 = arith.constant dense<0.000000e+00> : vector<8x32xf32>
    %27 = tpu.matmul %24, %25, %cst_30 {dimension_numbers = #tpu.dot_dimension_numbers<[1], [0], [0], [1], [0, 0, 1, 1], [], []>} : vector<8x64xf32>, vector<64x32xf32>, vector<8x32xf32> -> vector<8x32xf32>
    %28 = vector.broadcast %26 : vector<1x32xf32> to vector<8x32xf32>
    %29 = arith.addf %27, %28 : vector<8x32xf32>
    %cst_31 = arith.constant 0.000000e+00 : f32
    %30 = vector.broadcast %cst_31 : f32 to vector<8x32xf32>
    %31 = arith.maximumf %29, %30 : vector<8x32xf32>
    %c0_32 = arith.constant 0 : index
    %c0_33 = arith.constant 0 : index
    %32 = vector.load %arg14[%c0_32, %c0_33] : memref<1x32xf32, #tpu.memory_space<vmem>>, vector<1x32xf32>
    %cst_34 = arith.constant dense<0.000000e+00> : vector<1x8xf32>
    %33 = tpu.matmul %32, %7, %cst_34 {dimension_numbers = #tpu.dot_dimension_numbers<[1], [1], [0], [0], [0, 0, 1, 0], [], []>} : vector<1x32xf32>, vector<8x32xf32>, vector<1x8xf32> -> vector<1x8xf32>
    %c0_35 = arith.constant 0 : index
    %c0_36 = arith.constant 0 : index
    %34 = vector.load %arg15[%c0_35, %c0_36] : memref<1x32xf32, #tpu.memory_space<vmem>>, vector<1x32xf32>
    %cst_37 = arith.constant dense<0.000000e+00> : vector<1x8xf32>
    %35 = tpu.matmul %34, %31, %cst_37 {dimension_numbers = #tpu.dot_dimension_numbers<[1], [1], [0], [0], [0, 0, 1, 0], [], []>} : vector<1x32xf32>, vector<8x32xf32>, vector<1x8xf32> -> vector<1x8xf32>
    %36 = arith.addf %33, %35 : vector<1x8xf32>
    %c0_38 = arith.constant 0 : index
    %c0_39 = arith.constant 0 : index
    %37 = vector.load %arg16[%c0_38, %c0_39] : memref<1x1xf32, #tpu.memory_space<vmem>>, vector<1x1xf32>
    %38 = vector.broadcast %37 : vector<1x1xf32> to vector<1x8xf32>
    %39 = arith.addf %36, %38 : vector<1x8xf32>
    %40 = arith.negf %39 : vector<1x8xf32>
    %41 = math.exp %40 : vector<1x8xf32>
    %cst_40 = arith.constant 1.000000e+00 : f32
    %42 = vector.broadcast %cst_40 : f32 to vector<1x8xf32>
    %43 = arith.addf %42, %41 : vector<1x8xf32>
    %44 = arith.divf %42, %43 : vector<1x8xf32>
    %c0_41 = arith.constant 0 : index
    %c0_42 = arith.constant 0 : index
    %c0_43 = arith.constant 0 : index
    %45 = vector.load %arg17[%c0_41, %c0_42, %c0_43] : memref<1x1x8xf32, #tpu.memory_space<vmem>>, vector<1x1x8xf32>
    %46 = vector.shape_cast %45 : vector<1x1x8xf32> to vector<1x8xf32>
    %47 = vector.shape_cast %44 : vector<1x8xf32> to vector<1x1x8xf32>
    tpu.vector_store %arg17[%c0_41, %c0_42, %c0_43], %47 {strides = array<i32>} : memref<1x1x8xf32, #tpu.memory_space<vmem>>, vector<1x1x8xf32>,
    return
  }
  func.func @transform_4(%arg0: i32, %arg1: memref<8xi32, #tpu.memory_space<smem>>, %arg2: memref<8xi32, #tpu.memory_space<smem>>) -> (i32, i32) {
    %c0_i32 = arith.constant 0 : i32
    %c0_i32_0 = arith.constant 0 : i32
    %c0_i32_1 = arith.constant 0 : i32
    return %c0_i32, %c0_i32_0 : i32, i32
  }
  func.func @transform_5(%arg0: i32, %arg1: memref<8xi32, #tpu.memory_space<smem>>, %arg2: memref<8xi32, #tpu.memory_space<smem>>) -> (i32, i32) {
    %c0_i32 = arith.constant 0 : i32
    %c0_i32_0 = arith.constant 0 : i32
    %c0_i32_1 = arith.constant 0 : i32
    return %c0_i32, %c0_i32_0 : i32, i32
  }
  func.func @transform_6(%arg0: i32, %arg1: memref<8xi32, #tpu.memory_space<smem>>, %arg2: memref<8xi32, #tpu.memory_space<smem>>) -> (i32, i32) {
    %c0_i32 = arith.constant 0 : i32
    %c0_i32_0 = arith.constant 0 : i32
    %c0_i32_1 = arith.constant 0 : i32
    return %c0_i32, %c0_i32_0 : i32, i32
  }
  func.func @transform_7(%arg0: i32, %arg1: memref<8xi32, #tpu.memory_space<smem>>, %arg2: memref<8xi32, #tpu.memory_space<smem>>) -> (i32, i32) {
    %c0_i32 = arith.constant 0 : i32
    %c0_i32_0 = arith.constant 0 : i32
    %c0_i32_1 = arith.constant 0 : i32
    return %c0_i32, %c0_i32_0 : i32, i32
  }
  func.func @transform_8(%arg0: i32, %arg1: memref<8xi32, #tpu.memory_space<smem>>, %arg2: memref<8xi32, #tpu.memory_space<smem>>) -> (i32, i32) {
    %c0_i32 = arith.constant 0 : i32
    %c0_i32_0 = arith.constant 0 : i32
    %c0_i32_1 = arith.constant 0 : i32
    return %c0_i32, %c0_i32_0 : i32, i32
  }
  func.func @transform_9(%arg0: i32, %arg1: memref<8xi32, #tpu.memory_space<smem>>, %arg2: memref<8xi32, #tpu.memory_space<smem>>) -> (i32, i32) {
    %c0_i32 = arith.constant 0 : i32
    %c0_i32_0 = arith.constant 0 : i32
    %c0_i32_1 = arith.constant 0 : i32
    return %c0_i32, %c0_i32_0 : i32, i32
  }
  func.func @transform_10(%arg0: i32, %arg1: memref<8xi32, #tpu.memory_space<smem>>, %arg2: memref<8xi32, #tpu.memory_space<smem>>) -> (i32, i32) {
    %c0_i32 = arith.constant 0 : i32
    %c0_i32_0 = arith.constant 0 : i32
    %c0_i32_1 = arith.constant 0 : i32
    return %c0_i32, %c0_i32_0 : i32, i32
  }
  func.func @transform_11(%arg0: i32, %arg1: memref<8xi32, #tpu.memory_space<smem>>, %arg2: memref<8xi32, #tpu.memory_space<smem>>) -> (i32, i32) {
    %c0_i32 = arith.constant 0 : i32
    %c0_i32_0 = arith.constant 0 : i32
    %c0_i32_1 = arith.constant 0 : i32
    return %c0_i32, %c0_i32_0 : i32, i32
  }
  func.func @transform_12(%arg0: i32, %arg1: memref<8xi32, #tpu.memory_space<smem>>, %arg2: memref<8xi32, #tpu.memory_space<smem>>) -> (i32, i32) {
    %c0_i32 = arith.constant 0 : i32
    %c0_i32_0 = arith.constant 0 : i32
    %c0_i32_1 = arith.constant 0 : i32
    return %c0_i32, %c0_i32_0 : i32, i32
  }
  func.func @transform_13(%arg0: i32, %arg1: memref<8xi32, #tpu.memory_space<smem>>, %arg2: memref<8xi32, #tpu.memory_space<smem>>) -> (i32, i32) {
    %c0_i32 = arith.constant 0 : i32
    %c0_i32_0 = arith.constant 0 : i32
    %c0_i32_1 = arith.constant 0 : i32
    return %c0_i32, %c0_i32_0 : i32, i32
  }
  func.func @transform_14(%arg0: i32, %arg1: memref<8xi32, #tpu.memory_space<smem>>, %arg2: memref<8xi32, #tpu.memory_space<smem>>) -> (i32, i32, i32) {
    %c0_i32 = arith.constant 0 : i32
    %c0_i32_0 = arith.constant 0 : i32
    %c0_i32_1 = arith.constant 0 : i32
    return %arg0, %c0_i32, %c0_i32_0 : i32, i32, i32
  }
}

</mosaic_0001>

<bundles_post_ra>
// kernel: tpu_custom_call.1
= control target key start
LH: loop header
LB: loop body
LE: loop exit
PB: predicated region body
PF: predicated region fallthrough
CT: control target
= control target key end

     0   :  { %s1663_s0 = inlined_call_operand.hbm [shape: s32[8], index: 0, kind: input, shape index: {}]   ;;  %s1664_s2 = inlined_call_operand.vmem [shape: f32[64,32], index: 2, kind: input, shape index: {}]   ;;  %s1665_s3 = inlined_call_operand.vmem [shape: f32[64,32], index: 3, kind: input, shape index: {}]   ;;  %s1666_s4 = inlined_call_operand.vmem [shape: f32[64,128], index: 4, kind: input, shape index: {}]   ;;  %s1667_s5 = inlined_call_operand.vmem [shape: f32[64,128], index: 5, kind: input, shape index: {}]   ;;  %s1668_s6 = inlined_call_operand.vmem [shape: f32[128,128], index: 6, kind: input, shape index: {}]   ;;  %s1669_s7 = inlined_call_operand.vmem [shape: f32[128,128], index: 7, kind: input, shape index: {}]   ;;  %s1670_s8 = inlined_call_operand.vmem [shape: f32[1,128], index: 8, kind: input, shape index: {}]   ;;  %s1671_s9 = inlined_call_operand.vmem [shape: f32[128,64], index: 9, kind: input, shape index: {}]   ;;  %s1672_s10 = inlined_call_operand.vmem [shape: f32[1,64], index: 10, kind: input, shape index: {}]   ;;  %s1673_s11 = inlined_call_operand.vmem [shape: f32[64,32], index: 11, kind: input, shape index: {}]   ;;  %s1674_s12 = inlined_call_operand.vmem [shape: f32[1,32], index: 12, kind: input, shape index: {}]   ;;  %s1675_s13 = inlined_call_operand.vmem [shape: f32[1,32], index: 13, kind: input, shape index: {}]   ;;  %s1676_s14 = inlined_call_operand.vmem [shape: f32[1,32], index: 14, kind: input, shape index: {}]   ;;  %s1677_s16 = inlined_call_operand.hbm [shape: f32[1,1,8], index: 16, kind: output, shape index: {}]   ;;  %s1678_s1 = inlined_call_operand.vmem [shape: s32[8], index: 1, kind: input, shape index: {}]   ;;  %s1679_s15 = inlined_call_operand.<no memory space> [shape: f32[1,1], index: 15, kind: input, shape index: {}]  }
   0x1   :  { %1681 = sst [smem:[#allocation23_spill]] %s1663_s0 }
   0x2   :  { %1682 = sst [smem:[#allocation24_spill]] %s1672_s10  ;;  %s1683_s23 = sld [smem:[#allocation23_spill]] }
   0x8   :  { %s1232_s10 = scalar_lea.hbm %s1683_s23, 16 }
   0x9   :  { %p1233_p0 = scmp.ne.s32.totalorder %s1683_s23, %s1232_s10  ;;  %p1236_p1 = scmp.lt.u32.totalorder %s1232_s10, %s1683_s23 }
   0xb   :  { %p1238_p2 = pnand %p1236_p1, %p1233_p0 }
   0xd   :  { %1241 = shalt.err (!%p1238_p2)  }
   0xe   :  { %s1304_s28 = smov [#allocation8]   ;;  %v27_v0 = vstv %s1679_s15  ;;  %s23_s20 = sshll.u32 %s1678_s1, 4  ;;  %s24_s20 = int_to_ptr.vmem [resolvable:$true] %s23_s20 }
   0xf   :  { %22 = dma.hbm_to_smem %s1683_s23, 16, %s1304_s28, [#allocation7]  ;;  %28 = vst [vmem:[#allocation10] sm:$0x1] %v27_v0 }
  0x10   :  { %s1242_s21 = scalar_lea.vmem %s24_s20, 16  ;;  %p1247_p4 = scmp.lt.s32.totalorder %s24_s20, %s24_s20 }
  0x11   :  { %p1243_p3 = scmp.ne.s32.totalorder %s24_s20, %s1242_s21  ;;  %p1248_p5 = scmp.lt.s32.totalorder %s1242_s21, %s1242_s21 }
  0x13   :  { %p1249_p6 = por %p1248_p5, %p1247_p4 }
  0x15   :  { %p1250_p7 = pnand %p1249_p6, %p1243_p3 }
  0x17   :  { %1253 = shalt.err (!%p1250_p7)  }
  0x18   :  { %s1305_s10 = smov [#allocation9]  }
  0x19   :  { %26 = dma.vmem_to_smem %s24_s20, 16, %s1305_s10, [#allocation7] }
  0x1a   :  { %1284 = dma.done.wait [#allocation7], 32 }
  0x1b   :  { %1285 = vsyncadd [#allocation7], 4294967264 }
  0x1c   :  { %30 = sfence }
  0x1d   :  { %31 = vsyncpa [#allocation12], 0  ;;  %s1296_s15 = smov 0  }
  0x1e LB: > { %s60_s1 = sld [smem:[#allocation8 + %s1298_s15]]  ;;  %s63_s26 = scalar_lea.vmem [#allocation2], %s1298_s15  ;;  %s1298_s15 = sphi %s1296_s15, %s58_s15  }
  0x1f   : > { %s61_s22 = sld [smem:[#allocation9 + %s1298_s15]] }
  0x24   : > { %s62_s25 = scalar_lea.vmem %s1664_s2, %s60_s1 }
  0x25   : > { %v81_v1 = vld [vmem:[%s62_s25] sm:$0x1] }
  0x26   : > { %82 = vst [vmem:[%s63_s26] sm:$0x1] %v81_v1 }
  0x27   : > { %107 = vsyncadd [#allocation6], 16  ;;  %s108_s29 = scalar_lea.vmem %s1665_s3, %s61_s22  ;;  %s109_s30 = scalar_lea.vmem [#allocation3], %s1298_s15 }
  0x28   : > { %v128_v2 = vld [vmem:[%s108_s29] sm:$0x1] }
  0x29   : > { %129 = vst [vmem:[%s109_s30] sm:$0x1] %v128_v2 }
  0x2a   : > { %154 = vsyncadd [#allocation6 + $0x1], 16  ;;  %s155_s18 = scalar_lea.vmem %s1666_s4, %s60_s1  ;;  %s156_s19 = scalar_lea.vmem [#allocation4], %s1298_s15 }
  0x2b   : > { %v175_v3 = vld [vmem:[%s155_s18] sm:$0x1] }
  0x2c   : > { %176 = vst [vmem:[%s156_s19] sm:$0x1] %v175_v3 }
  0x2d   : > { %201 = vsyncadd [#allocation6 + $0x2], 16  ;;  %s202_s10 = scalar_lea.vmem %s1667_s5, %s61_s22  ;;  %s203_s23 = scalar_lea.vmem [#allocation5], %s1298_s15 }
  0x2e   : > { %v222_v4 = vld [vmem:[%s202_s10] sm:$0x1] }
  0x2f   : > { %223 = vst [vmem:[%s203_s23] sm:$0x1] %v222_v4 }
  0x30   : > { %248 = vsyncadd [#allocation6 + $0x3], 16  ;;  %s58_s15 = sadd.s32 1, %s1298_s15  }
  0x31   : > { %p55_p8 = scmp.ge.s32.totalorder %s58_s15, 8  }
  0x32   :  { %s1300_s24 = smov (%p55_p8), 0  }
  0x33   :  { %57 = sbr.rel (!%p55_p8) target bundleno = 30 (0x1e), region = 251 }
  0x3a LB: > { %1286 = dma.done.wait [#allocation6], 16  ;;  %s1302_s24 = sphi %s1300_s24, %s254_s24  }
  0x3b   : > { %1287 = vsyncadd [#allocation6], 4294967280 }
  0x3c   : > { %1288 = dma.done.wait [#allocation6 + $0x1], 16 }
  0x3d   : > { %1289 = vsyncadd [#allocation6 + $0x1], 4294967280 }
  0x3e   : > { %1290 = dma.done.wait [#allocation6 + $0x2], 16 }
  0x3f   : > { %1291 = vsyncadd [#allocation6 + $0x2], 4294967280 }
  0x40   : > { %1292 = dma.done.wait [#allocation6 + $0x3], 16 }
  0x41   : > { %1293 = vsyncadd [#allocation6 + $0x3], 4294967280  ;;  %s254_s24 = sadd.s32 1, %s1302_s24  }
  0x42   : > { %p251_p9 = scmp.ge.s32.totalorder %s254_s24, 8  }
  0x43   :  { %v287_v5 = vld [vmem:[%s1669_s7] sm:$0xff] (%p251_p9)  ;;  %v288_v6 = vld [vmem:[%s1669_s7 + $0x8] sm:$0xff] (%p251_p9)  ;;  %v1306_v8 = vmov (%p251_p9), 0.0|0.0   ;;  %v289_v11 = vld [vmem:[%s1669_s7 + $0x10] sm:$0xff] (%p251_p9)  ;;  %vm1307_vm0 = vmmov (%p251_p9), 0   ;;  %v1308_v16 = vmov (%p251_p9), 0.0  }
  0x44   :  { %253 = sbr.rel (!%p251_p9) target bundleno = 58 (0x3a), region = 262  ;;  %v271_v7 = vld [vmem:[%s1668_s6] sm:$0xff] (%p251_p9)  ;;  %1120 = vmatprep.subr.bf16.mxu0 (%p251_p9), %v1306_v8  ;;  %1144 = vmatprep.subr.bf16.mxu1 (%p251_p9), %v1306_v8  ;;  %v1121_v9 = vpack.c.bf16 (%p251_p9), %v288_v6, %v287_v5  ;;  %v272_v10 = vld [vmem:[%s1668_s6 + $0x8] sm:$0xff] (%p251_p9)  ;;  %v290_v12 = vld [vmem:[%s1669_s7 + $0x18] sm:$0xff] (%p251_p9)  ;;  %vm561_vm1 = vcmask (%p251_p9), 523264   ;;  %vm638_vm2 = vcmask (%p251_p9), 261120  }
  0x45   :  { %v1145_v13 = vpack.c.bf16 (%p251_p9), %v272_v10, %v271_v7  ;;  %v273_v14 = vld [vmem:[%s1668_s6 + $0x10] sm:$0xff] (%p251_p9)  ;;  %v274_v15 = vld [vmem:[%s1668_s6 + $0x18] sm:$0xff] (%p251_p9)  ;;  %1018 = vmatprep.mubr.msk.f32.mxu0 (%p251_p9), %vm1307_vm0, %v1308_v16  ;;  %1053 = vmatprep.mubr.msk.f32.mxu1 (%p251_p9), %vm1307_vm0, %v1308_v16  ;;  %v1124_v17 = vpack.c.bf16 (%p251_p9), %v290_v12, %v289_v11  ;;  %v291_v19 = vld [vmem:[%s1669_s7 + $0x20] sm:$0xff] (%p251_p9)  ;;  %vm808_vm3 = vcmask (%p251_p9), 57344  }
  0x46   :  { %1122 = vmatpush3.bf16.msra.mxu0 (%p251_p9), %v1121_v9  ;;  %v1148_v18 = vpack.c.bf16 (%p251_p9), %v274_v15, %v273_v14  ;;  %v292_v20 = vld [vmem:[%s1669_s7 + $0x28] sm:$0xff] (%p251_p9)  ;;  %v275_v21 = vld [vmem:[%s1668_s6 + $0x20] sm:$0xff] (%p251_p9)  ;;  %v293_v25 = vld [vmem:[%s1669_s7 + $0x30] sm:$0xff] (%p251_p9) }
  0x47   :  { %1146 = vmatpush3.bf16.msra.mxu1 (%p251_p9), %v1145_v13  ;;  %1123 = vmatprep.subr.bf16.mxu0 (%p251_p9), %v1306_v8  ;;  %v276_v22 = vld [vmem:[%s1668_s6 + $0x28] sm:$0xff] (%p251_p9)  ;;  %v1127_v23 = vpack.c.bf16 (%p251_p9), %v292_v20, %v291_v19  ;;  %v294_v26 = vld [vmem:[%s1669_s7 + $0x38] sm:$0xff] (%p251_p9)  ;;  %v277_v27 = vld [vmem:[%s1668_s6 + $0x30] sm:$0xff] (%p251_p9) }
  0x48   :  { %1147 = vmatprep.subr.bf16.mxu1 (%p251_p9), %v1306_v8  ;;  %v1151_v24 = vpack.c.bf16 (%p251_p9), %v276_v22, %v275_v21  ;;  %v278_v28 = vld [vmem:[%s1668_s6 + $0x38] sm:$0xff] (%p251_p9)  ;;  %v1130_v29 = vpack.c.bf16 (%p251_p9), %v294_v26, %v293_v25  ;;  %v295_v31 = vld [vmem:[%s1669_s7 + $0x40] sm:$0xff] (%p251_p9)  ;;  %v296_v32 = vld [vmem:[%s1669_s7 + $0x48] sm:$0xff] (%p251_p9) }
  0x49   :  { %v1154_v30 = vpack.c.bf16 (%p251_p9), %v278_v28, %v277_v27  ;;  %v279_v33 = vld [vmem:[%s1668_s6 + $0x40] sm:$0xff] (%p251_p9)  ;;  %v280_v34 = vld [vmem:[%s1668_s6 + $0x48] sm:$0xff] (%p251_p9)  ;;  %v1133_v35 = vpack.c.bf16 (%p251_p9), %v296_v32, %v295_v31  ;;  %v297_v37 = vld [vmem:[%s1669_s7 + $0x50] sm:$0xff] (%p251_p9) }
  0x4a   :  { %1125 = vmatpush3.bf16.msra.mxu0 (%p251_p9), %v1124_v17  ;;  %v1157_v36 = vpack.c.bf16 (%p251_p9), %v280_v34, %v279_v33  ;;  %v298_v38 = vld [vmem:[%s1669_s7 + $0x58] sm:$0xff] (%p251_p9)  ;;  %v281_v39 = vld [vmem:[%s1668_s6 + $0x50] sm:$0xff] (%p251_p9)  ;;  %v299_v43 = vld [vmem:[%s1669_s7 + $0x60] sm:$0xff] (%p251_p9) }
  0x4b   :  { %1149 = vmatpush3.bf16.msra.mxu1 %v1148_v18  ;;  %1126 = vmatprep.subr.bf16.mxu0 %v1306_v8  ;;  %v282_v40 = vld [vmem:[%s1668_s6 + $0x58] sm:$0xff]  ;;  %v1136_v41 = vpack.c.bf16 %v298_v38, %v297_v37  ;;  %v300_v44 = vld [vmem:[%s1669_s7 + $0x68] sm:$0xff]  ;;  %v283_v45 = vld [vmem:[%s1668_s6 + $0x60] sm:$0xff] }
  0x4c   :  { %1150 = vmatprep.subr.bf16.mxu1 %v1306_v8  ;;  %v1160_v42 = vpack.c.bf16 %v282_v40, %v281_v39  ;;  %v284_v46 = vld [vmem:[%s1668_s6 + $0x68] sm:$0xff]  ;;  %v1139_v47 = vpack.c.bf16 %v300_v44, %v299_v43  ;;  %v301_v49 = vld [vmem:[%s1669_s7 + $0x70] sm:$0xff]  ;;  %v302_v50 = vld [vmem:[%s1669_s7 + $0x78] sm:$0xff]  ;;  %s1684_s7 = sld [smem:[#allocation24_spill]]  ;;  %v1309_v44 = vmov 0  }
  0x4d   :  { %v1163_v48 = vpack.c.bf16 %v284_v46, %v283_v45  ;;  %v285_v51 = vld [vmem:[%s1668_s6 + $0x70] sm:$0xff]  ;;  %v286_v52 = vld [vmem:[%s1668_s6 + $0x78] sm:$0xff]  ;;  %v1142_v53 = vpack.c.bf16 %v302_v50, %v301_v49  ;;  %v452_v55 = vld [vmem:[%s1671_s9] sm:$0xff]  ;;  %1227 = vset.pattern.permute.xlu0 %v1309_v44 }
  0x4e   :  { %1128 = vmatpush3.bf16.msra.mxu0 %v1127_v23  ;;  %v1166_v54 = vpack.c.bf16 %v286_v52, %v285_v51  ;;  %v453_v56 = vld [vmem:[%s1671_s9 + $0x8] sm:$0xff]  ;;  %v269_v57 = vld [vmem:[#allocation5] sm:$0xff]  ;;  %v268_v59 = vld [vmem:[#allocation4] sm:$0xff] }
  0x4f   :  { %1152 = vmatpush3.bf16.msra.mxu1 %v1151_v24  ;;  %1129 = vmatprep.subr.bf16.mxu0 %v1306_v8  ;;  %v1169_v58 = vpack.c.bf16 %v453_v56, %v452_v55  ;;  %v454_v60 = vld [vmem:[%s1671_s9 + $0x10] sm:$0xff]  ;;  %v455_v61 = vld [vmem:[%s1671_s9 + $0x18] sm:$0xff]  ;;  %v456_v63 = vld [vmem:[%s1671_s9 + $0x20] sm:$0xff]  ;;  %v797_v55 = vlaneseq }
  0x50   :  { %1153 = vmatprep.subr.bf16.mxu1 %v1306_v8  ;;  %v1172_v62 = vpack.c.bf16 %v455_v61, %v454_v60  ;;  %v457_v0 = vld [vmem:[%s1671_s9 + $0x28] sm:$0xff]  ;;  %v458_v2 = vld [vmem:[%s1671_s9 + $0x30] sm:$0xff]  ;;  %v459_v3 = vld [vmem:[%s1671_s9 + $0x38] sm:$0xff] }
  0x51   :  { %v1175_v1 = vpack.c.bf16 %v457_v0, %v456_v63  ;;  %v1178_v4 = vpack.c.bf16 %v459_v3, %v458_v2  ;;  %v460_v5 = vld [vmem:[%s1671_s9 + $0x40] sm:$0xff]  ;;  %v461_v6 = vld [vmem:[%s1671_s9 + $0x48] sm:$0xff]  ;;  %v462_v9 = vld [vmem:[%s1671_s9 + $0x50] sm:$0xff]  ;;  %v798_v56 = vshrl.u32 %v797_v55, 7 }
  0x52   :  { %1131 = vmatpush3.bf16.msra.mxu0 %v1130_v29  ;;  %v1181_v7 = vpack.c.bf16 %v461_v6, %v460_v5  ;;  %v463_v10 = vld [vmem:[%s1671_s9 + $0x58] sm:$0xff]  ;;  %v464_v12 = vld [vmem:[%s1671_s9 + $0x60] sm:$0xff]  ;;  %v465_v13 = vld [vmem:[%s1671_s9 + $0x68] sm:$0xff] }
  0x53   :  { %1155 = vmatpush3.bf16.msra.mxu1 %v1154_v30  ;;  %1132 = vmatprep.subr.bf16.mxu0 %v1306_v8  ;;  %v1184_v11 = vpack.c.bf16 %v463_v10, %v462_v9  ;;  %v1187_v14 = vpack.c.bf16 %v465_v13, %v464_v12  ;;  %v466_v15 = vld [vmem:[%s1671_s9 + $0x70] sm:$0xff]  ;;  %v467_v17 = vld [vmem:[%s1671_s9 + $0x78] sm:$0xff]  ;;  %v546_v19 = vld [vmem:[%s1673_s11] sm:$0xff] }
  0x54   :  { %1156 = vmatprep.subr.bf16.mxu1 %v1306_v8  ;;  %v1190_v18 = vpack.c.bf16 %v467_v17, %v466_v15  ;;  %v547_v20 = vld [vmem:[%s1673_s11 + $0x8] sm:$0xff]  ;;  %v548_v21 = vld [vmem:[%s1673_s11 + $0x10] sm:$0xff]  ;;  %v549_v23 = vld [vmem:[%s1673_s11 + $0x18] sm:$0xff] }
  0x55   :  { %v1193_v22 = vpack.c.bf16 %v547_v20, %v546_v19  ;;  %v1196_v24 = vpack.c.bf16 %v549_v23, %v548_v21  ;;  %v550_v25 = vld [vmem:[%s1673_s11 + $0x20] sm:$0xff]  ;;  %v551_v26 = vld [vmem:[%s1673_s11 + $0x28] sm:$0xff] }
  0x56   :  { %1134 = vmatpush3.bf16.msra.mxu0 %v1133_v35  ;;  %v1199_v27 = vpack.c.bf16 %v551_v26, %v550_v25  ;;  %v909_v30 = vld [vmem:[%s1670_s8] ss:$0 sm:$0xff]  ;;  %v267_v50 = vld [vmem:[#allocation3] sm:$0xff] }
  0x57   :  { %1158 = vmatpush3.bf16.msra.mxu1 %v1157_v36  ;;  %1135 = vmatprep.subr.bf16.mxu0 %v1306_v8  ;;  %v552_v36 = vld [vmem:[%s1673_s11 + $0x30] sm:$0xff]  ;;  %v910_v38 = vld [vmem:[%s1684_s7] ss:$0 sm:$0xff] }
  0x58   :  { %1159 = vmatprep.subr.bf16.mxu1 %v1306_v8  ;;  %v791_v43 = vld [vmem:[#allocation10] sm:$0x1] }
  0x59   :  { %794 = vperm.xlu0 %1227, %v791_v43   ;;  %v911_v45 = vld [vmem:[%s1674_s12] ss:$0 sm:$0xff] }
  0x5a   :  { %1137 = vmatpush3.bf16.msra.mxu0 %v1136_v41  ;;  %v266_v49 = vld [vmem:[#allocation2] sm:$0xff] }
  0x5b   :  { %1161 = vmatpush3.bf16.msra.mxu1 %v1160_v42  ;;  %1138 = vmatprep.subr.bf16.mxu0 %v1306_v8  ;;  %v637_v52 = vld [vmem:[%s1676_s14] sm:$0x1]  ;;  %s1310_s14 = smov [#allocation11]  }
  0x5c   :  { %1162 = vmatprep.subr.bf16.mxu1 %v1306_v8  ;;  %s816_s3 = sshll.u32 %s1310_s14, 4  ;;  %s817_s3 = int_to_ptr.vmem [resolvable:$true] %s816_s3 }
  0x5d   :  { %s1258_s4 = scalar_lea.vmem %s817_s3, 32  ;;  %p1259_p11 = scmp.lt.s32.totalorder %s817_s3, %s817_s3 }
  0x5e   :  { %1140 = vmatpush3.bf16.msra.mxu0 %v1139_v47 }
  0x5f   :  { %1164 = vmatpush3.bf16.msra.mxu1 %v1163_v48  ;;  %1141 = vmatprep.subr.bf16.mxu0 %v1306_v8 }
  0x60   :  { %1165 = vmatprep.subr.bf16.mxu1 %v1306_v8 }
  0x62   :  { %1143 = vmatpush3.bf16.msra.mxu0 %v1142_v53  ;;  %v270_v53 = vmul.f32 %v267_v50, %v266_v49 }
  0x63   :  { %1167 = vmatpush3.bf16.msra.mxu1 %v1166_v54  ;;  %1168 = vmatprep.subr.bf16.mxu0 %v1306_v8  ;;  %v636_v54 = vld [vmem:[%s1675_s13] sm:$0x1]  ;;  %s1254_s13 = scalar_lea.vmem %s817_s3, 16 }
  0x64   :  { %1192 = vmatprep.subr.bf16.mxu1 %v1306_v8  ;;  %p1255_p10 = scmp.ne.s32.totalorder %s817_s3, %s1254_s13  ;;  %p1260_p12 = scmp.lt.s32.totalorder %s1258_s4, %s1254_s13 }
  0x65   :  { %1019 = vmatmul.mubr.f32.vlgmr.msra.gmra.mrb[0].mxu0 %v269_v57  ;;  %v799_v57 = vsub.s32 0, %v798_v56 }
  0x66   :  { %1054 = vmatmul.mubr.f32.vlgmr.msra.gmra.mrb[0].mxu1 %v268_v59  ;;  %1170 = vmatpush3.bf16.msra.mxu0 %v1169_v58  ;;  %p1261_p13 = por %p1260_p12, %p1259_p11 }
  0x67   :  { %1171 = vmatprep.subr.bf16.mxu0 %v1306_v8  ;;  %1088 = vmatprep.mubr.msk.f32.mxu0 %vm1307_vm0, %v1308_v16 }
  0x68   :  { %1107 = vmatprep.mubr.msk.f32.mxu1 %vm1307_vm0, %v1308_v16  ;;  %1194 = vmatpush3.bf16.msra.mxu1 %v1193_v22  ;;  %p1262_p0 = pnand %p1261_p13, %p1255_p10 }
  0x69   :  { %1195 = vmatprep.subr.bf16.mxu1 %v1306_v8 }
  0x6a   :  { %1173 = vmatpush3.bf16.msra.mxu0 %v1172_v62 }
  0x6b   :  { %1174 = vmatprep.subr.bf16.mxu0 %v1306_v8 }
  0x6c   :  { %1197 = vmatpush3.bf16.msra.mxu1 %v1196_v24 }
  0x6d   :  { %1198 = vmatprep.subr.bf16.mxu1 %v1306_v8 }
  0x6e   :  { %1176 = vmatpush3.bf16.msra.mxu0 %v1175_v1 }
  0x6f   :  { %1177 = vmatprep.subr.bf16.mxu0 %v1306_v8 }
  0x70   :  { %1200 = vmatpush3.bf16.msra.mxu1 %v1199_v27 }
  0x71   :  { %1201 = vmatprep.subr.bf16.mxu1 %v1306_v8 }
  0x72   :  { %1179 = vmatpush3.bf16.msra.mxu0 %v1178_v4 }
  0x73   :  { %1180 = vmatprep.subr.bf16.mxu0 %v1306_v8 }
  0x76   :  { %1182 = vmatpush3.bf16.msra.mxu0 %v1181_v7 }
  0x77   :  { %1183 = vmatprep.subr.bf16.mxu0 %v1306_v8 }
  0x7a   :  { %1185 = vmatpush3.bf16.msra.mxu0 %v1184_v11 }
  0x7b   :  { %1186 = vmatprep.subr.bf16.mxu0 %v1306_v8 }
  0x7e   :  { %1188 = vmatpush3.bf16.msra.mxu0 %v1187_v14 }
  0x7f   :  { %1189 = vmatprep.subr.bf16.mxu0 %v1306_v8  ;;  %v553_v8 = vld [vmem:[%s1673_s11 + $0x38] sm:$0xff] }
  0x80   :  { %v1202_v37 = vpack.c.bf16 %v553_v8, %v552_v36 }
  0x82   :  { %1191 = vmatpush3.bf16.msra.mxu0 %v1190_v18  ;;  %1203 = vmatpush3.bf16.msra.mxu1 %v1202_v37 }
  0x83   :  { %1110 = vmatprep.subr.mxu1 %v1308_v16 }
  0xd8   :  { %v795_v59 = vpop.permute.xlu0 %794 }
  0xd9   :  { %v800_v61 = vrot.slane %v795_v59, %v799_v57 }
 0x138   :  { %v369_v28 = vpop.f32.mrb[0].mxu0 }
 0x139   :  { %v439_v29 = vpop.f32.mrb[0].mxu1  ;;  %v1020_v31 = vpop.f32.mrb[1].mxu0 }
 0x13a   :  { %v440_v32 = vadd.f32 %v439_v29, %v369_v28  ;;  %v1055_v33 = vpop.f32.mrb[1].mxu1 }
 0x13c   :  { %v450_v34 = vadd.f32 %v909_v30, %v440_v32 }
 0x13e   :  { %v451_v35 = vmax.f32 %v450_v34, 0.0 }
 0x140   :  { %1089 = vmatmul.mubr.f32.vlgmr.msra.gmra.mrb[2].mxu0 %v451_v35 }
 0x213   :  { %v541_v39 = vpop.f32.mrb[2].mxu0 }
 0x214   :  { %v542_v40 = vadd.f32 %v910_v38, %v541_v39  ;;  %v1090_v41 = vpop.f32.mrb[3].mxu0 }
 0x216   :  { %v545_v42 = vmax.f32 %v542_v40, 0.0 }
 0x218   :  { %1108 = vmatmul.mubr.msk.f32.vlgmr.msra.gmra.mrb[2].mxu1 %vm561_vm1, %v545_v42 }
 0x219   :  { %1112 = vmatprep.mubr.msk.f32.mxu1 %vm1307_vm0, %v1308_v16 }
 0x2eb   :  { %v631_v46 = vpop.f32.mrb[2].mxu1 }
 0x2ec   :  { %v632_v47 = vadd.f32 %v911_v45, %v631_v46  ;;  %v1109_v48 = vpop.f32.mrb[3].mxu1 }
 0x2ee   :  { %v635_v51 = vmax.f32 %v632_v47, 0.0 }
 0x2f0   :  { %1111 = vmatpush3.xpose.msk.msra.mxu1 %vm638_vm2, %v635_v51 }
 0x2f1   :  { %1115 = vmatprep.subr.mxu1 %v1308_v16 }
 0x2f3   :  { %1113 = vmatmul.mubr.msk.f32.vlgmr.msra.gmra.mrb[4].mxu1 %vm638_vm2, %v637_v52 }
 0x2f4   :  { %1116 = vmatpush3.xpose.msk.msra.mxu1 %vm638_vm2, %v270_v53  ;;  %1117 = vmatprep.mubr.msk.f32.mxu1 %vm1307_vm0, %v1308_v16 }
 0x2f7   :  { %1118 = vmatmul.mubr.msk.f32.vlgmr.msra.gmra.mrb[6].mxu1 %vm638_vm2, %v636_v54 }
 0x3c6   :  { %v711_v58 = vpop.f32.mrb[4].mxu1 }
 0x3c7   :  { %v1114_v60 = vpop.f32.mrb[5].mxu1 }
 0x3ca   :  { %v787_v62 = vpop.f32.mrb[6].mxu1 }
 0x3cb   :  { %v788_v63 = vadd.f32 %v787_v62, %v711_v58  ;;  %v1119_v0 = vpop.f32.mrb[7].mxu1 }
 0x3cd   :  { %v801_v1 = vadd.f32 %v800_v61, %v788_v63 }
 0x3cf   :  { %v917_v2 = vmul.f32 -1.442695, %v801_v1 }
 0x3d1   :  { %1228 = vpow2.f32 %v917_v2 }
 0x3db   :  { %v1229_v3 = vpop.eup %1228 }
 0x3dc   :  { %v805_v16 = vadd.f32 1.0, %v1229_v3 }
 0x3de   :  { %1230 = vrcp.f32 %v805_v16 }
 0x3e8   :  { %v1231_v4 = vpop.eup %1230 }
 0x3e9   :  { %809 = vst.msk [vmem:[#allocation11] sm:$0x1] %vm808_vm3, %v1231_v4 }
 0x3ea   :  { %1265 = shalt.err (!%p1262_p0)
}
 0x3eb   :  { %s1266_s25 = scalar_lea.hbm %s1677_s16, 16 }
 0x3ec   :  { %p1267_p1 = scmp.ne.s32.totalorder %s1677_s16, %s1266_s25  ;;  %p1270_p2 = scmp.lt.u32.totalorder %s1266_s25, %s1677_s16 }
 0x3ee   :  { %p1272_p3 = pnand %p1270_p2, %p1267_p1 }
 0x3f0   :  { %1275 = shalt.err (!%p1272_p3)
}
 0x3f1   :  { %819 = dma.vmem_to_hbm [thread:$0]  %s817_s3, 16, %s1677_s16, [#allocation12]  }
 0x3f2   :  { %1294 = dma.done.wait [#allocation12], 16  }
 0x3f3   :  { %1295 = vsyncadd [#allocation12], 4294967280 }
 0x3f4   :  { %823 = vsyncpa [#allocation12], 1 }
 0x3f5   :  { %824 = vsyncmov [#allocation6] }
 0x3f8   :  { %s825_s0 = vpop.sfrf %824 }
 0x3f9   :  { %p918_p4 = scmp.ne.s32.totalorder %s825_s0, 0 }
 0x3fb   :  { %829 = shalt.err (%p918_p4)  }
 0x3fc   :  { %831 = vsyncmov [#allocation6 + $0x1] }
 0x3ff   :  { %s832_s17 = vpop.sfrf %831 }
 0x400   :  { %p919_p5 = scmp.ne.s32.totalorder %s832_s17, 0 }
 0x402   :  { %836 = shalt.err (%p919_p5)  }
 0x403   :  { %838 = vsyncmov [#allocation6 + $0x2] }
 0x406   :  { %s839_s18 = vpop.sfrf %838 }
 0x407   :  { %p920_p6 = scmp.ne.s32.totalorder %s839_s18, 0 }
 0x409   :  { %843 = shalt.err (%p920_p6)  }
 0x40a   :  { %845 = vsyncmov [#allocation6 + $0x3] }
 0x40d   :  { %s846_s19 = vpop.sfrf %845 }
 0x40e   :  { %p921_p7 = scmp.ne.s32.totalorder %s846_s19, 0 }
 0x410   :  { %850 = shalt.err (%p921_p7)  }

</bundles_post_ra>
